<compile_context>
chip_gen: v7x
topology: tpu7x:2x2x1
jax: 0.10.0
libtpu: 0.0.40
codegen_flags: <defaults>
</compile_context>

<pallas_src>
import math

import jax
import jax.numpy as jnp
from jax.experimental import pallas as pl
from jax.experimental.pallas import tpu as pltpu

LN_EPS = 1e-5


def gpt_embedding_kernel(ids_ref, tok_hbm, pos_ref, gamma_ref, beta_ref,
                         out_ref, tok_buf, sem):
    # ids_ref : (B, S) int32 in SMEM (scalar prefetch)
    # tok_hbm : (V, D) token table left in HBM (memory_space=pl.ANY)
    # pos_ref : (T, D) positional rows for this sequence tile (auto-pipelined)
    # gamma_ref / beta_ref : (1, D) LayerNorm affine params
    # out_ref : (T, D) dense output tile of the flattened (B*S, D) output
    # tok_buf : (2, T, D) VMEM ring buffer for the gathered token rows
    # sem     : (2, T) DMA semaphores (one per gathered row per slot)
    _, T, D = tok_buf.shape
    b = pl.program_id(0)
    j = pl.program_id(1)
    num_tiles = pl.num_programs(1)
    slot = jax.lax.rem(j, 2)

    def start_tile_fetch(tile_idx, slot_idx):
        # Issue T independent row-gather DMAs (all in flight concurrently).
        def issue(i, carry):
            row = ids_ref[b, tile_idx * T + i]
            pltpu.make_async_copy(
                tok_hbm.at[row], tok_buf.at[slot_idx, i], sem.at[slot_idx, i]
            ).start()
            return carry
        jax.lax.fori_loop(0, T, issue, 0)

    # Prime the within-batch-row pipeline at the first sequence tile.
    @pl.when(j == 0)
    def _():
        start_tile_fetch(0, 0)

    # Prefetch the next sequence tile (reads next tile's ids from SMEM) BEFORE
    # waiting on the current tile's semaphores, so the gather latency is hidden
    # behind this tile's LayerNorm compute + store.
    @pl.when(j + 1 < num_tiles)
    def _():
        start_tile_fetch(j + 1, 1 - slot)

    # Wait for the current tile's T row copies.
    def wait_row(i, carry):
        pltpu.make_async_copy(
            tok_hbm.at[0], tok_buf.at[slot, i], sem.at[slot, i]
        ).wait()
        return carry
    jax.lax.fori_loop(0, T, wait_row, 0)

    # tok embedding (canonical TokenEmbedding * sqrt(D) scaling) + positional rows
    tok = tok_buf[slot].astype(jnp.float32) * jnp.float32(math.sqrt(D))
    pos = pos_ref[...].astype(jnp.float32)
    x = tok + pos                                           # (T, D)

    # LayerNorm over the embedding dim (math kept in f32)
    mean = jnp.mean(x, axis=-1, keepdims=True)
    centered = x - mean
    var = jnp.mean(centered * centered, axis=-1, keepdims=True)
    xhat = centered * jax.lax.rsqrt(var + LN_EPS)
    y = xhat * gamma_ref[...].astype(jnp.float32) + beta_ref[...].astype(jnp.float32)

    # TODO(synk): nn.Dropout in training mode would need pltpu.prng_seed/prng_random_bits;
    # eval-mode dropout is the identity, which is what we implement here.
    out_ref[...] = y.astype(out_ref.dtype)


def gpt_embedding(input_ids, tok_table, pos_table, gamma, beta, *, seq_tile=None):
    B, S = input_ids.shape
    V, D = tok_table.shape
    max_seq = pos_table.shape[0]
    assert S <= max_seq, "sequence length exceeds positional table"
    assert S % 8 == 0, "sequence length must be a multiple of 8 for dense tiles"

    if seq_tile is None:
        seq_tile = S
        for t in (512, 256, 128, 64, 32, 16, 8):
            if S % t == 0:
                seq_tile = t
                break
    T = seq_tile
    assert S % T == 0 and T % 8 == 0
    num_tiles = S // T

    grid_spec = pltpu.PrefetchScalarGridSpec(
        num_scalar_prefetch=1,                     # input_ids -> SMEM
        grid=(B, num_tiles),
        in_specs=[
            # token table stays in HBM; rows gathered manually via make_async_copy
            pl.BlockSpec(memory_space=pl.ANY),
            # positional rows for this sequence tile (sequence-contiguous)
            pl.BlockSpec((T, D), lambda b, j, ids: (j, 0)),
            # LayerNorm gamma / beta (constant block, fetched once)
            pl.BlockSpec((1, D), lambda b, j, ids: (0, 0)),
            pl.BlockSpec((1, D), lambda b, j, ids: (0, 0)),
        ],
        # lane/sublane-dense output: flattened (B*S, D), (T, D) blocks
        out_specs=pl.BlockSpec((T, D), lambda b, j, ids: (b * num_tiles + j, 0)),
        scratch_shapes=[
            pltpu.VMEM((2, T, D), tok_table.dtype),   # double-buffered gather staging
            pltpu.SemaphoreType.DMA((2, T)),          # one DMA sem per row per slot
        ],
    )

    out_flat = pl.pallas_call(
        gpt_embedding_kernel,
        out_shape=jax.ShapeDtypeStruct((B * S, D), jnp.float32),
        grid_spec=grid_spec,
        compiler_params=pltpu.CompilerParams(
            dimension_semantics=("parallel", "arbitrary")),
    )(input_ids, tok_table, pos_table, gamma, beta)
    return out_flat.reshape(B, S, D)


def reference(input_ids, tok_table, pos_table, gamma, beta):
    D = tok_table.shape[1]
    tok = tok_table[input_ids].astype(jnp.float32) * jnp.float32(math.sqrt(D))
    pos = pos_table[: input_ids.shape[1]].astype(jnp.float32)[None, :, :]
    x = tok + pos
    mean = jnp.mean(x, axis=-1, keepdims=True)
    var = jnp.mean((x - mean) ** 2, axis=-1, keepdims=True)
    xhat = (x - mean) * jax.lax.rsqrt(var + LN_EPS)
    return xhat * gamma[0] + beta[0]


if __name__ == "__main__":
    # Small synthetic config (D = one full 128-lane vreg, two sequence tiles per batch row
    # so both the prime and the double-buffered prefetch paths are exercised).
    VOCAB, EMBED, MAX_SEQ = 64, 128, 32
    B, S = 2, 16
    SEQ_TILE = 8

    key = jax.random.PRNGKey(0)
    k_ids, k_tok, k_pos = jax.random.split(key, 3)

    input_ids = jax.random.randint(k_ids, (B, S), 0, VOCAB, dtype=jnp.int32)
    tok_table = jax.random.normal(k_tok, (VOCAB, EMBED), dtype=jnp.float32) * 0.02
    pos_table = jax.random.normal(k_pos, (MAX_SEQ, EMBED), dtype=jnp.float32) * 0.02
    gamma = jnp.ones((1, EMBED), dtype=jnp.float32)   # nn.LayerNorm default weight
    beta = jnp.zeros((1, EMBED), dtype=jnp.float32)   # nn.LayerNorm default bias

    out = gpt_embedding(input_ids, tok_table, pos_table, gamma, beta,
                        seq_tile=SEQ_TILE)
    out = jax.block_until_ready(out)

    ref = reference(input_ids, tok_table, pos_table, gamma, beta)
    assert out.shape == (B, S, EMBED)
    assert jnp.allclose(out, ref, atol=1e-4, rtol=1e-4), \
        f"max abs err {jnp.max(jnp.abs(out - ref))}"

    print("KERNEL_OK")
</pallas_src>

<mosaic_0001>
module attributes {stable_mosaic.version = 11 : i64} {
  func.func @gpt_embedding_kernel(%arg0: i32, %arg1: i32, %arg2: memref<2x16xi32, #tpu.memory_space<smem>>, %arg3: memref<64x128xf32, #tpu.memory_space<any>>, %arg4: memref<8x128xf32, #tpu.memory_space<vmem>>, %arg5: memref<1x128xf32, #tpu.memory_space<vmem>>, %arg6: memref<1x128xf32, #tpu.memory_space<vmem>>, %arg7: memref<8x128xf32, #tpu.memory_space<vmem>>, %arg8: memref<2x8x128xf32, #tpu.memory_space<vmem>>, %arg9: memref<2x8x!tpu.dma_semaphore, #tpu.memory_space<semaphore_mem>>) attributes {dimension_semantics = [#tpu.dimension_semantics<parallel>, #tpu.dimension_semantics<arbitrary>], iteration_bounds = array<i64: 2, 2>, scalar_prefetch = 1 : i64, scratch_operands = 2 : i64, tpu.core_type = #tpu.core_type<tc>, window_params = [{}, {transform_indices = @transform_1, window_bounds = array<i64: 8, 128>}, {pipeline_mode = #tpu.pipeline_mode<synchronous>, transform_indices = @transform_2, window_bounds = array<i64: 1, 128>}, {pipeline_mode = #tpu.pipeline_mode<synchronous>, transform_indices = @transform_3, window_bounds = array<i64: 1, 128>}, {transform_indices = @transform_4, window_bounds = array<i64: 8, 128>}]} {
    %c2_i32 = arith.constant 2 : i32
    %0 = arith.remsi %arg1, %c2_i32 : i32
    %c0_i32 = arith.constant 0 : i32
    %1 = arith.cmpi eq, %arg1, %c0_i32 : i32
    %2 = arith.extui %1 : i1 to i32
    %c0_i32_0 = arith.constant 0 : i32
    %3 = arith.cmpi ne, %2, %c0_i32_0 : i32
    scf.if %3 {
      %c0_i32_20 = arith.constant 0 : i32
      %c8_i32_21 = arith.constant 8 : i32
      %39 = arith.addi %c0_i32_20, %c8_i32_21 : i32
      %c1_i32_22 = arith.constant 1 : i32
      scf.for %arg10 = %c0_i32_20 to %39 step %c1_i32_22  : i32 {
        %c0_i32_24 = arith.constant 0 : i32
        %40 = arith.addi %c0_i32_24, %arg10 : i32
        %41 = arith.index_cast %arg0 : i32 to index
        %42 = arith.index_cast %40 : i32 to index
        %43 = memref.load %arg2[%41, %42] : memref<2x16xi32, #tpu.memory_space<smem>>
        %c0_i32_25 = arith.constant 0 : i32
        %c0_i32_26 = arith.constant 0 : i32
        %c0_i32_27 = arith.constant 0 : i32
        %44 = tpu.memref_slice %arg3[%43, %c0_i32_27] : memref<64x128xf32, #tpu.memory_space<any>> -> memref<1x128xf32, #tpu.memory_space<any>>
        %45 = tpu.memref_squeeze %44 : memref<1x128xf32, #tpu.memory_space<any>> -> memref<128xf32, #tpu.memory_space<any>>
        %c0_i32_28 = arith.constant 0 : i32
        %46 = tpu.memref_slice %arg8[%c0_i32_25, %arg10, %c0_i32_28] : memref<2x8x128xf32, #tpu.memory_space<vmem>> -> memref<1x1x128xf32, #tpu.memory_space<vmem>>
        %47 = tpu.memref_squeeze %46 : memref<1x1x128xf32, #tpu.memory_space<vmem>> -> memref<128xf32, #tpu.memory_space<vmem>>
        %48 = tpu.memref_slice %arg9[%c0_i32_26, %arg10] : memref<2x8x!tpu.dma_semaphore, #tpu.memory_space<semaphore_mem>> -> memref<1x1x!tpu.dma_semaphore, #tpu.memory_space<semaphore_mem>>
        %49 = tpu.memref_squeeze %48 : memref<1x1x!tpu.dma_semaphore, #tpu.memory_space<semaphore_mem>> -> memref<!tpu.dma_semaphore, #tpu.memory_space<semaphore_mem>>
        tpu.enqueue_dma source(%45 : memref<128xf32, #tpu.memory_space<any>>) target(%47 : memref<128xf32, #tpu.memory_space<vmem>>) target_semaphore(%49 : memref<!tpu.dma_semaphore, #tpu.memory_space<semaphore_mem>>)
      }
      %c8_i32_23 = arith.constant 8 : i32
    } else {
    }
    %c1_i32 = arith.constant 1 : i32
    %4 = arith.addi %arg1, %c1_i32 : i32
    %c2_i32_1 = arith.constant 2 : i32
    %5 = arith.cmpi slt, %4, %c2_i32_1 : i32
    %6 = arith.extui %5 : i1 to i32
    %c0_i32_2 = arith.constant 0 : i32
    %7 = arith.cmpi ne, %6, %c0_i32_2 : i32
    scf.if %7 {
      %c1_i32_20 = arith.constant 1 : i32
      %39 = arith.addi %arg1, %c1_i32_20 : i32
      %c1_i32_21 = arith.constant 1 : i32
      %40 = arith.subi %c1_i32_21, %0 : i32
      %c0_i32_22 = arith.constant 0 : i32
      %c8_i32_23 = arith.constant 8 : i32
      %41 = arith.addi %c0_i32_22, %c8_i32_23 : i32
      %c1_i32_24 = arith.constant 1 : i32
      scf.for %arg10 = %c0_i32_22 to %41 step %c1_i32_24  : i32 {
        %c8_i32_26 = arith.constant 8 : i32
        %42 = arith.muli %39, %c8_i32_26 : i32
        %43 = arith.addi %42, %arg10 : i32
        %44 = arith.index_cast %arg0 : i32 to index
        %45 = arith.index_cast %43 : i32 to index
        %46 = memref.load %arg2[%44, %45] : memref<2x16xi32, #tpu.memory_space<smem>>
        %c0_i32_27 = arith.constant 0 : i32
        %47 = tpu.memref_slice %arg3[%46, %c0_i32_27] : memref<64x128xf32, #tpu.memory_space<any>> -> memref<1x128xf32, #tpu.memory_space<any>>
        %48 = tpu.memref_squeeze %47 : memref<1x128xf32, #tpu.memory_space<any>> -> memref<128xf32, #tpu.memory_space<any>>
        %c0_i32_28 = arith.constant 0 : i32
        %49 = tpu.memref_slice %arg8[%40, %arg10, %c0_i32_28] : memref<2x8x128xf32, #tpu.memory_space<vmem>> -> memref<1x1x128xf32, #tpu.memory_space<vmem>>
        %50 = tpu.memref_squeeze %49 : memref<1x1x128xf32, #tpu.memory_space<vmem>> -> memref<128xf32, #tpu.memory_space<vmem>>
        %51 = tpu.memref_slice %arg9[%40, %arg10] : memref<2x8x!tpu.dma_semaphore, #tpu.memory_space<semaphore_mem>> -> memref<1x1x!tpu.dma_semaphore, #tpu.memory_space<semaphore_mem>>
        %52 = tpu.memref_squeeze %51 : memref<1x1x!tpu.dma_semaphore, #tpu.memory_space<semaphore_mem>> -> memref<!tpu.dma_semaphore, #tpu.memory_space<semaphore_mem>>
        tpu.enqueue_dma source(%48 : memref<128xf32, #tpu.memory_space<any>>) target(%50 : memref<128xf32, #tpu.memory_space<vmem>>) target_semaphore(%52 : memref<!tpu.dma_semaphore, #tpu.memory_space<semaphore_mem>>)
      }
      %c8_i32_25 = arith.constant 8 : i32
    } else {
    }
    %c0_i32_3 = arith.constant 0 : i32
    %c8_i32 = arith.constant 8 : i32
    %8 = arith.addi %c0_i32_3, %c8_i32 : i32
    %c1_i32_4 = arith.constant 1 : i32
    scf.for %arg10 = %c0_i32_3 to %8 step %c1_i32_4  : i32 {
      %c0_i32_20 = arith.constant 0 : i32
      %c0_i32_21 = arith.constant 0 : i32
      %39 = tpu.memref_slice %arg3[%c0_i32_20, %c0_i32_21] : memref<64x128xf32, #tpu.memory_space<any>> -> memref<1x128xf32, #tpu.memory_space<any>>
      %40 = tpu.memref_squeeze %39 : memref<1x128xf32, #tpu.memory_space<any>> -> memref<128xf32, #tpu.memory_space<any>>
      %c0_i32_22 = arith.constant 0 : i32
      %41 = tpu.memref_slice %arg8[%0, %arg10, %c0_i32_22] : memref<2x8x128xf32, #tpu.memory_space<vmem>> -> memref<1x1x128xf32, #tpu.memory_space<vmem>>
      %42 = tpu.memref_squeeze %41 : memref<1x1x128xf32, #tpu.memory_space<vmem>> -> memref<128xf32, #tpu.memory_space<vmem>>
      %43 = tpu.memref_slice %arg9[%0, %arg10] : memref<2x8x!tpu.dma_semaphore, #tpu.memory_space<semaphore_mem>> -> memref<1x1x!tpu.dma_semaphore, #tpu.memory_space<semaphore_mem>>
      %44 = tpu.memref_squeeze %43 : memref<1x1x!tpu.dma_semaphore, #tpu.memory_space<semaphore_mem>> -> memref<!tpu.dma_semaphore, #tpu.memory_space<semaphore_mem>>
      tpu.wait_dma2 semaphore(%44 : memref<!tpu.dma_semaphore, #tpu.memory_space<semaphore_mem>>) src(%40 : memref<128xf32, #tpu.memory_space<any>>) dst(%42 : memref<128xf32, #tpu.memory_space<vmem>>)
    }
    %c8_i32_5 = arith.constant 8 : i32
    %9 = arith.index_cast %0 : i32 to index
    %c0 = arith.constant 0 : index
    %c0_6 = arith.constant 0 : index
    %10 = vector.load %arg8[%9, %c0, %c0_6] : memref<2x8x128xf32, #tpu.memory_space<vmem>>, vector<1x8x128xf32>
    %11 = vector.shape_cast %10 : vector<1x8x128xf32> to vector<8x128xf32>
    %cst = arith.constant 11.3137083 : f32
    %12 = vector.broadcast %cst : f32 to vector<8x128xf32>
    %13 = arith.mulf %11, %12 : vector<8x128xf32>
    %c0_7 = arith.constant 0 : index
    %c0_8 = arith.constant 0 : index
    %14 = vector.load %arg4[%c0_7, %c0_8] : memref<8x128xf32, #tpu.memory_space<vmem>>, vector<8x128xf32>
    %15 = arith.addf %13, %14 : vector<8x128xf32>
    %cst_9 = arith.constant dense<0.000000e+00> : vector<8xf32>
    %16 = vector.multi_reduction <add>, %15, %cst_9 [1] : vector<8x128xf32> to vector<8xf32>
    %17 = vector.shape_cast %16 : vector<8xf32> to vector<8x1xf32>
    %cst_10 = arith.constant 1.280000e+02 : f32
    %18 = vector.broadcast %cst_10 : f32 to vector<8x1xf32>
    %19 = arith.divf %17, %18 : vector<8x1xf32>
    %20 = vector.broadcast %19 : vector<8x1xf32> to vector<8x128xf32>
    %21 = arith.subf %15, %20 : vector<8x128xf32>
    %22 = arith.mulf %21, %21 : vector<8x128xf32>
    %cst_11 = arith.constant dense<0.000000e+00> : vector<8xf32>
    %23 = vector.multi_reduction <add>, %22, %cst_11 [1] : vector<8x128xf32> to vector<8xf32>
    %24 = vector.shape_cast %23 : vector<8xf32> to vector<8x1xf32>
    %cst_12 = arith.constant 1.280000e+02 : f32
    %25 = vector.broadcast %cst_12 : f32 to vector<8x1xf32>
    %26 = arith.divf %24, %25 : vector<8x1xf32>
    %cst_13 = arith.constant 9.99999974E-6 : f32
    %27 = vector.broadcast %cst_13 : f32 to vector<8x1xf32>
    %28 = arith.addf %26, %27 : vector<8x1xf32>
    %29 = math.rsqrt %28 : vector<8x1xf32>
    %30 = vector.broadcast %29 : vector<8x1xf32> to vector<8x128xf32>
    %31 = arith.mulf %21, %30 : vector<8x128xf32>
    %c0_14 = arith.constant 0 : index
    %c0_15 = arith.constant 0 : index
    %32 = vector.load %arg5[%c0_14, %c0_15] : memref<1x128xf32, #tpu.memory_space<vmem>>, vector<1x128xf32>
    %33 = vector.broadcast %32 : vector<1x128xf32> to vector<8x128xf32>
    %34 = arith.mulf %31, %33 : vector<8x128xf32>
    %c0_16 = arith.constant 0 : index
    %c0_17 = arith.constant 0 : index
    %35 = vector.load %arg6[%c0_16, %c0_17] : memref<1x128xf32, #tpu.memory_space<vmem>>, vector<1x128xf32>
    %36 = vector.broadcast %35 : vector<1x128xf32> to vector<8x128xf32>
    %37 = arith.addf %34, %36 : vector<8x128xf32>
    %c0_18 = arith.constant 0 : index
    %c0_19 = arith.constant 0 : index
    %38 = vector.load %arg7[%c0_18, %c0_19] : memref<8x128xf32, #tpu.memory_space<vmem>>, vector<8x128xf32>
    tpu.vector_store %arg7[%c0_18, %c0_19], %37 {strides = array<i32>} : memref<8x128xf32, #tpu.memory_space<vmem>>, vector<8x128xf32>,
    return
  }
  func.func @transform_1(%arg0: i32, %arg1: i32, %arg2: memref<2x16xi32, #tpu.memory_space<smem>>) -> (i32, i32) {
    %c0_i32 = arith.constant 0 : i32
    %c0_i32_0 = arith.constant 0 : i32
    return %arg1, %c0_i32 : i32, i32
  }
  func.func @transform_2(%arg0: i32, %arg1: i32, %arg2: memref<2x16xi32, #tpu.memory_space<smem>>) -> (i32, i32) {
    %c0_i32 = arith.constant 0 : i32
    %c0_i32_0 = arith.constant 0 : i32
    %c0_i32_1 = arith.constant 0 : i32
    return %c0_i32, %c0_i32_0 : i32, i32
  }
  func.func @transform_3(%arg0: i32, %arg1: i32, %arg2: memref<2x16xi32, #tpu.memory_space<smem>>) -> (i32, i32) {
    %c0_i32 = arith.constant 0 : i32
    %c0_i32_0 = arith.constant 0 : i32
    %c0_i32_1 = arith.constant 0 : i32
    return %c0_i32, %c0_i32_0 : i32, i32
  }
  func.func @transform_4(%arg0: i32, %arg1: i32, %arg2: memref<2x16xi32, #tpu.memory_space<smem>>) -> (i32, i32) {
    %c2_i32 = arith.constant 2 : i32
    %0 = arith.muli %arg0, %c2_i32 : i32
    %1 = arith.addi %0, %arg1 : i32
    %c0_i32 = arith.constant 0 : i32
    %c0_i32_0 = arith.constant 0 : i32
    return %1, %c0_i32 : i32, i32
  }
}

</mosaic_0001>

<bundles_post_ra>
// kernel: tpu_custom_call.1
= control target key start
LH: loop header
LB: loop body
LE: loop exit
PB: predicated region body
PF: predicated region fallthrough
CT: control target
= control target key end

     0   :  { %s1339_s0 = inlined_call_operand.hbm [shape: s32[2,16], index: 0, kind: input, shape index: {}]   ;;  %s1340_s1 = inlined_call_operand.hbm [shape: f32[64,128], index: 1, kind: input, shape index: {}]   ;;  %s1341_s2 = inlined_call_operand.hbm [shape: f32[32,128], index: 2, kind: input, shape index: {}]   ;;  %s1342_s3 = inlined_call_operand.vmem [shape: f32[1,128], index: 3, kind: input, shape index: {}]   ;;  %s1343_s4 = inlined_call_operand.vmem [shape: f32[1,128], index: 4, kind: input, shape index: {}]   ;;  %s1344_s5 = inlined_call_operand.hbm [shape: f32[32,128], index: 5, kind: output, shape index: {}]  }
   0x1   :  { %1358 = sst [smem:[#allocation32_spill]] %s1341_s2  ;;  %s752_s20 = scalar_lea.hbm %s1339_s0, 32 }
   0x2   :  { %p753_p0 = scmp.ne.s32.totalorder %s1339_s0, %s752_s20  ;;  %p756_p1 = scmp.lt.u32.totalorder %s752_s20, %s1339_s0 }
   0x4   :  { %p758_p2 = pnand %p756_p1, %p753_p0 }
   0x6   :  { %761 = shalt.err (!%p758_p2)  }
   0x7   :  { %s992_s25 = smov [#allocation5]  }
   0x8   :  { %11 = dma.hbm_to_smem %s1339_s0, 32, %s992_s25, [#allocation4] }
   0x9   :  { %924 = dma.done.wait [#allocation4], 32 }
   0xa   :  { %925 = vsyncadd [#allocation4], 4294967264 }
   0xb   :  { %13 = sfence }
   0xc   :  { %14 = vsyncpa [#allocation7], 0 }
   0xd   :  { %16 = vsyncpa [#allocation7 + $0x1], 0 }
   0xe   :  { %17 = vsyncpa [#allocation8], 0 }
   0xf   :  { %19 = vsyncpa [#allocation8 + $0x1], 0  ;;  %s1039_s28 = smov 0   ;;  %s1041_s29 = smov 0  }
  0x10   :  { %s1043_s30 = smov 0   ;;  %s1045_s6 = smov 0  }
  0x11   :  { %s1047_s7 = smov 0   ;;  %s1049_s8 = smov 0  }
  0x12   :  { %s1051_s0 = smov 0   ;;  %s1053_s9 = smov 0  }
  0x13   :  { %s1055_s10 = smov 0   ;;  %s1057_s11 = smov 0  }
  0x14   :  { %s1059_s12 = smov 0  }
  0x15 LB: > { %1359 = sst [smem:[#allocation20_spill]] %s938_s28  ;;  %s576_s13 = sadd.s32 4294967295, %s978_s12   ;;  %s978_s12 = sphi %s1059_s12, %s25_s12   ;;  %s974_s11 = sphi %s1057_s11, %s1400_s11   ;;  %s970_s10 = sphi %s1055_s10, %s1396_s10   ;;  %s966_s9 = sphi %s1053_s9, %s1395_s9   ;;  %s962_s0 = sphi %s1051_s0, %s1394_s0   ;;  %s958_s8 = sphi %s1049_s8, %s1393_s8   ;;  %s954_s7 = sphi %s1047_s7, %s1392_s7   ;;  %s950_s6 = sphi %s1045_s6, %s1391_s6   ;;  %s946_s30 = sphi %s1043_s30, %s1390_s30   ;;  %s942_s29 = sphi %s1041_s29, %s1399_s29   ;;  %s938_s28 = sphi %s1039_s28, %s1398_s28  }
  0x16   : > { %1360 = sst [smem:[#allocation21_spill]] %s946_s30  ;;  %s577_s14 = sadd.s32 4294967294, %s978_s12  }
  0x17   : > { %1361 = sst [smem:[#allocation22_spill]] %s954_s7  ;;  %s34_s15 = sadd.s32 1, %s970_s10 }
  0x18   : > { %1362 = sst [smem:[#allocation23_spill]] %s958_s8  ;;  %s37_s16 = sadd.s32 1, %s974_s11 }
  0x19   : > { %1363 = sst [smem:[#allocation24_spill]] %s970_s10  ;;  %p35_p3 = scmp.ge.s32.totalorder %s34_s15, 2 }
  0x1a   : > { %1364 = sst [smem:[#allocation25_spill]] %s974_s11  ;;  %s44_s17 = sadd.s32 1, %s958_s8 }
  0x1b   : > { %1365 = sst [smem:[#allocation26_spill]] %s978_s12  ;;  %p51_p4 = scmp.ne.s32.totalorder %s958_s8, %s954_s7 }
  0x1c   : > { %p52_p5 = scmp.eq.s32.totalorder %s978_s12, 0  ;;  %s1402_s15 = smov (%p35_p3, %s34_s15), 0 }
  0x1d   : > { %1366 = sst [smem:[#allocation27_spill]] %s1402_s15  ;;  %s1404_s16 = smov (!%p35_p3, %s37_s16), %s974_s11 }
  0x1e   : > { %s41_s18 = ssub.s32 %s970_s10, %s1402_s15  ;;  %p1105_p6 = por %p52_p5, %p51_p4 }
  0x1f   : > { %p39_p7 = scmp.ge.s32.totalorder %s1404_s16, 2  ;;  %p42_p8 = scmp.eq.s32.totalorder %s41_s18, 0 }
  0x20   : > { %p57_p9 = scmp.ne.s32.totalorder %s954_s7, %s950_s6  ;;  %p58_p10 = scmp.eq.s32.totalorder %s576_s13, 0 }
  0x21   : > { %s1406_s16 = smov (%p39_p7, %s1404_s16), 0  ;;  %s578_s22 = sshll.u32 %s974_s11, 1 }
  0x22   : > { %1368 = sst [smem:[#allocation28_spill]] %s1406_s16  ;;  %p1115_p11 = por %p58_p10, %p57_p9 }
  0x23   : > { %s1113_s20 = scalar_select %p42_p8, %s958_s8, %s44_s17  }
  0x24   : > { %s110_s23 = sadd.s32 %s970_s10, %s578_s22  ;;  %s579_s24 = sshll.u32 %s1406_s16, 1 }
  0x25   : > { %1369 = sst [smem:[#allocation29_spill]] %s1113_s20  ;;  %s112_s25 = sadd.s32 %s579_s24, %s1402_s15 }
  0x26   : > { %s116_s26 = sadd.s32 1, %s946_s30  ;;  %s113_s27 = ssub.s32 %s110_s23, %s112_s25 }
  0x27   : > { %p126_p12 = scmp.ne.s32.totalorder %s946_s30, %s942_s29  ;;  %p114_p13 = scmp.eq.s32.totalorder %s113_s27, 0 }
  0x28   : > { %p127_p0 = scmp.eq.s32.totalorder %s576_s13, 3  ;;  %p132_p1 = scmp.ne.s32.totalorder %s942_s29, %s938_s28 }
  0x29   : > { %p133_p2 = scmp.eq.s32.totalorder %s577_s14, 3  ;;  %p635_p5 = scmp.lt.s32.totalorder %s978_s12, 4 }
  0x2a   : > { %s1129_s6 = scalar_select %p114_p13, %s946_s30, %s116_s26  }
  0x2b   : > { %p1131_p3 = por %p127_p0, %p126_p12  ;;  %p1135_p4 = por %p133_p2, %p132_p1 }
  0x2c   : > { %1371 = sst [smem:[#allocation30_spill]] %s1129_s6  ;;  %s159_s22 = sand.u32 1, %s958_s8  }
  0x2d   : > { %s1372_s17 = scalar_select %p1131_p3, 1, 0 }
  0x2e   : > { %s1373_s18 = scalar_select %p1135_p4, 1, 0 }
  0x2f   : > { %s583_s23 = sshll.u32 %s970_s10, 7  ;;  %s582_s24 = sshll.u32 %s159_s22, 3 }
  0x30   : > { %1374 = sst [smem:[#allocation31_spill]] %s1373_s18  ;;  %s1375_s2 = sld [smem:[#allocation32_spill]] }
  0x31   : > { %s163_s14 = scalar_lea.vmem [#allocation6], %s582_s24  ;;  %p1149_p7 = pnand %p635_p5, %p1105_p6 }
  0x32   : > { %s170_s26 = sshll.u32 %s163_s14, 4  ;;  %s160_s25 = scalar_lea.sflag [#allocation7], %s159_s22  ;;  %s1153_s26 = int_to_ptr.vmem [resolvable:$true] %s170_s26 }
  0x33   : > { %p764_p12 = pneg %p1149_p7 }
  0x36   : > { %s1145_s13 = scalar_lea.hbm %s1375_s2, %s583_s23  ;;  %s767_s27 = scalar_lea.hbm %s1375_s2, 512 }
  0x37   : > { %s762_s23 = scalar_lea.hbm %s1145_s13, 128  ;;  %p768_p6 = scmp.lt.u32.totalorder %s1145_s13, %s1375_s2 }
  0x38   : > { %p763_p10 = scmp.ne.s32.totalorder %s1145_s13, %s762_s23  ;;  %p769_p1 = scmp.lt.u32.totalorder %s767_s27, %s762_s23 }
  0x39   : > { %p771_p5 = scmp.lt.u32.totalorder %s762_s23, %s1145_s13 }
  0x3a   : > { %p765_p13 = pnand %p764_p12, %p763_p10  ;;  %p770_p2 = por %p769_p1, %p768_p6 }
  0x3c   : > { %p766_p0 = pneg %p765_p13  ;;  %p772_p8 = por %p771_p5, %p770_p2 }
  0x3e   : > { %p773_p9 = pnand %p772_p8, %p766_p0 }
  0x40   : > { %776 = shalt.err (!%p773_p9)
}
  0x41   : > { %s777_s22 = scalar_lea.vmem %s1153_s26, 128  ;;  %s993_s19 = smov [#allocation6]  }
  0x42   : > { %p778_p10 = scmp.ne.s32.totalorder %s1153_s26, %s777_s22  ;;  %s782_s24 = sshll.u32 %s993_s19, 4  ;;  %s783_s24 = int_to_ptr.vmem [resolvable:$false] %s782_s24 }
  0x43   : > { %s784_s15 = scalar_lea.vmem %s783_s24, 256  ;;  %p785_p3 = scmp.lt.s32.totalorder %s1153_s26, %s783_s24 }
  0x44   : > { %p780_p13 = pnand %p778_p10, %p764_p12  ;;  %p786_p6 = scmp.lt.s32.totalorder %s784_s15, %s777_s22 }
  0x46   : > { %p781_p4 = pneg %p780_p13  ;;  %p787_p1 = por %p786_p6, %p785_p3 }
  0x48   : > { %p788_p2 = pnand %p787_p1, %p781_p4 }
  0x4a   : > { %791 = shalt.err (!%p788_p2)
}
  0x4b   : > { %630 = dma.hbm_to_vmem [thread:$0]  (!%p1149_p7), %s1145_s13, 128, %s1153_s26, %s160_s25  }
  0x4c   : > { %p1377_p8 = scmp.lt.s32.totalorder %s978_s12, 5  ;;  %p1378_p9 = scmp.ge.s32.totalorder %s978_s12, 1 }
  0x4e   : > { %p176_p12 = pnand %p1378_p9, %p1377_p8 }
  0x4f   : > { %s181_s23 = sand.u32 (!%p176_p12), 1, %s954_s7  }
  0x50   : > { %179 = sbr.rel (%p176_p12) target bundleno = 536 (0x218), region = 32  ;;  %s1187_s27 = sshll.u32 (!%p176_p12), %s181_s23, 3 }
  0x51   : > { %s182_s14 = scalar_lea.sflag (!%p176_p12), [#allocation7], %s181_s23 }
  0x57   : > { %927 = dma.done.wait (%p1115_p11), %s182_s14, 128  }
  0x58   : > { %929 = vsyncadd (%p1115_p11), %s182_s14, 4294967168  ;;  %s1348_s16 = sand.u32 1, %s942_s29   ;;  %p210_p3 = scmp.lt.s32.totalorder %s962_s0, 0 }
  0x59   : > { %s1198_s13 = sshll.u32 %s1348_s16, 3  ;;  %s211_s26 = ssub.s32 0, %s962_s0 }
  0x5a   : > { %s587_s25 = smin.u32 %s962_s0, %s211_s26  ;;  %p588_p11 = scmp.ne.s32.totalorder %s962_s0, 0 }
  0x5b   : > { %s213_s19 = sand.u32 1, %s587_s25   ;;  %s1206_s21 = smov (!%p588_p11), 0  }
  0x5c   : > { %s214_s24 = ssub.s32 0, %s213_s19  ;;  %219 = sbr.rel (%p588_p11) target bundleno = 142 (0x8e), region = 40 }
  0x5d   : > { %s1408_s24 = smov (!%p210_p3, %s214_s24), %s213_s19 }
  0x63 LB: >> { %s226_s23 = sshra.s32 %s982_s21, 7  ;;  %s231_s14 = sand.u32 127, %s982_s21  ;;  %s982_s21 = sphi %s1206_s21, %s225_s21  }
  0x64   : >> { %s228_s26 = sadd.s32 %s966_s9, %s226_s23  ;;  %s236_s15 = scalar_lea.vmem [#allocation2], %s982_s21 }
  0x65   : >> { %s589_s25 = sshll.u32 %s228_s26, 7  ;;  %s245_s22 = sshll.u32 %s236_s15, 4  ;;  %s246_s22 = int_to_ptr.vmem [resolvable:$true] %s245_s22 }
  0x66   : >> { %s232_s19 = sadd.s32 %s589_s25, %s231_s14  ;;  %s237_s8 = scalar_lea.sflag [#allocation3], %s982_s21 }
  0x67   : >> { %s233_s16 = sld [smem:[#allocation5 + %s232_s19]]  ;;  %s794_s18 = scalar_lea.hbm %s1340_s1, 1024 }
  0x6d   : >> { %s590_s2 = sshll.u32 %s233_s16, 4 }
  0x6e   : >> { %s235_s20 = scalar_lea.hbm %s1340_s1, %s590_s2 }
  0x6f   : >> { %s792_s7 = scalar_lea.hbm %s235_s20, 16  ;;  %p795_p7 = scmp.lt.u32.totalorder %s235_s20, %s1340_s1 }
  0x70   : >> { %p793_p4 = scmp.ne.s32.totalorder %s235_s20, %s792_s7  ;;  %p796_p0 = scmp.lt.u32.totalorder %s794_s18, %s792_s7 }
  0x71   : >> { %p798_p10 = scmp.lt.u32.totalorder %s792_s7, %s235_s20 }
  0x72   : >> { %p797_p5 = por %p796_p0, %p795_p7 }
  0x74   : >> { %p799_p13 = por %p798_p10, %p797_p5 }
  0x76   : >> { %p800_p6 = pnand %p799_p13, %p793_p4 }
  0x78   : >> { %803 = shalt.err (!%p800_p6)  }
  0x79   : >> { %s804_s16 = scalar_lea.vmem %s246_s22, 16  ;;  %s994_s2 = smov [#allocation2]  }
  0x7a   : >> { %p805_p1 = scmp.ne.s32.totalorder %s246_s22, %s804_s16  ;;  %s806_s10 = sshll.u32 %s994_s2, 4  ;;  %s807_s10 = int_to_ptr.vmem [resolvable:$false] %s806_s10 }
  0x7b   : >> { %s808_s11 = scalar_lea.vmem %s807_s10, 256  ;;  %p809_p2 = scmp.lt.s32.totalorder %s246_s22, %s807_s10 }
  0x7c   : >> { %p810_p8 = scmp.lt.s32.totalorder %s808_s11, %s804_s16 }
  0x7e   : >> { %p811_p9 = por %p810_p8, %p809_p2 }
  0x80   : >> { %p812_p12 = pnand %p811_p9, %p805_p1 }
  0x82   : >> { %815 = shalt.err (!%p812_p12)  }
  0x83   : >> { %248 = dma.hbm_to_vmem [thread:$0]  %s235_s20, 16, %s246_s22, %s237_s8 }
  0x84   : >> { %s225_s21 = sadd.s32 1, %s982_s21  }
  0x85   : >> { %p222_p3 = scmp.ge.s32.totalorder %s225_s21, 8  }
  0x87   : > { %224 = sbr.rel (!%p222_p3) target bundleno = 99 (0x63), region = 137 }
  0x8e PF: > { %s249_s28 = sadd.s32 1, %s962_s0 }
  0x8f   : > { %p591_p11 = scmp.ge.s32.totalorder %s249_s28, 2 }
  0x90   : > { %s1230_s7 = smov (!%p591_p11), 0  }
  0x91   : > { %253 = sbr.rel (%p591_p11) target bundleno = 198 (0xc6), region = 55 }
  0x98 LB: >> { %s621_s8 = sshll.u32 %s962_s0, 3  ;;  %s1379_s30 = ssub.s32 1, %s1408_s24  ;;  %s986_s7 = sphi %s1230_s7, %s260_s7  }
  0x99   : >> { %s622_s20 = sadd.s32 8, %s621_s8  ;;  %s595_s18 = sshll.u32 %s1379_s30, 3 }
  0x9a   : >> { %s262_s6 = sadd.s32 %s986_s7, %s622_s20  ;;  %s1241_s14 = sadd.s32 %s986_s7, %s595_s18 }
  0x9b   : >> { %s263_s22 = sshra.s32 %s262_s6, 7  ;;  %s268_s15 = sand.u32 127, %s262_s6 }
  0x9c   : >> { %s265_s21 = sadd.s32 %s966_s9, %s263_s22  ;;  %s275_s23 = scalar_lea.vmem [#allocation2], %s1241_s14 }
  0x9d   : >> { %s593_s26 = sshll.u32 %s265_s21, 7  ;;  %s284_s16 = sshll.u32 %s275_s23, 4  ;;  %s285_s16 = int_to_ptr.vmem [resolvable:$true] %s284_s16 }
  0x9e   : >> { %s269_s25 = sadd.s32 %s593_s26, %s268_s15  ;;  %s276_s8 = scalar_lea.sflag [#allocation3], %s1241_s14 }
  0x9f   : >> { %s270_s19 = sld [smem:[#allocation5 + %s269_s25]]  ;;  %s818_s18 = scalar_lea.hbm %s1340_s1, 1024 }
  0xa5   : >> { %s594_s2 = sshll.u32 %s270_s19, 4 }
  0xa6   : >> { %s272_s28 = scalar_lea.hbm %s1340_s1, %s594_s2 }
  0xa7   : >> { %s816_s20 = scalar_lea.hbm %s272_s28, 16  ;;  %p819_p7 = scmp.lt.u32.totalorder %s272_s28, %s1340_s1 }
  0xa8   : >> { %p817_p4 = scmp.ne.s32.totalorder %s272_s28, %s816_s20  ;;  %p820_p0 = scmp.lt.u32.totalorder %s818_s18, %s816_s20 }
  0xa9   : >> { %p822_p10 = scmp.lt.u32.totalorder %s816_s20, %s272_s28 }
  0xaa   : >> { %p821_p5 = por %p820_p0, %p819_p7 }
  0xac   : >> { %p823_p13 = por %p822_p10, %p821_p5 }
  0xae   : >> { %p824_p6 = pnand %p823_p13, %p817_p4 }
  0xb0   : >> { %827 = shalt.err (!%p824_p6)  }
  0xb1   : >> { %s828_s15 = scalar_lea.vmem %s285_s16, 16  ;;  %s995_s21 = smov [#allocation2]  }
  0xb2   : >> { %p829_p1 = scmp.ne.s32.totalorder %s285_s16, %s828_s15  ;;  %s830_s14 = sshll.u32 %s995_s21, 4  ;;  %s831_s14 = int_to_ptr.vmem [resolvable:$false] %s830_s14 }
  0xb3   : >> { %s832_s26 = scalar_lea.vmem %s831_s14, 256  ;;  %p833_p2 = scmp.lt.s32.totalorder %s285_s16, %s831_s14 }
  0xb4   : >> { %p834_p8 = scmp.lt.s32.totalorder %s832_s26, %s828_s15 }
  0xb6   : >> { %p835_p9 = por %p834_p8, %p833_p2 }
  0xb8   : >> { %p836_p12 = pnand %p835_p9, %p829_p1 }
  0xba   : >> { %839 = shalt.err (!%p836_p12)  }
  0xbb   : >> { %287 = dma.hbm_to_vmem [thread:$0]  %s272_s28, 16, %s285_s16, %s276_s8 }
  0xbc   : >> { %s260_s7 = sadd.s32 1, %s986_s7  }
  0xbd   : >> { %p257_p3 = scmp.ge.s32.totalorder %s260_s7, 8  }
  0xbf   : > { %259 = sbr.rel (!%p257_p3) target bundleno = 152 (0x98), region = 148 }
  0xc6 PF: > { %s988_s12 = smov 0  }
  0xc7 LB: >> { %s596_s30 = sshll.u32 %s1408_s24, 3  ;;  %s990_s12 = sphi %s988_s12, %s293_s12  }
  0xc8   : >> { %s295_s25 = sadd.s32 %s990_s12, %s596_s30 }
  0xc9   : >> { %s296_s19 = scalar_lea.sflag [#allocation3], %s295_s25 }
  0xca   : >> { %930 = dma.done.wait %s296_s19, 16 }
  0xcb   : >> { %931 = vsyncadd %s296_s19, 4294967280  ;;  %s293_s12 = sadd.s32 1, %s990_s12  }
  0xcc   : >> { %p290_p11 = scmp.ge.s32.totalorder %s293_s12, 8  }
  0xcd   : > { %s300_s23 = scalar_lea.vmem (%p290_p11), [#allocation2], %s596_s30  ;;  %s1380_s7 = scalar_lea.vmem (%p290_p11), [#allocation6], %s1187_s27  ;;  %v598_v12 = vld [vmem:[%s1342_s3] ss:$0 sm:$0xff] (%p290_p11) }
  0xce   : > { %292 = sbr.rel (!%p290_p11) target bundleno = 199 (0xc7), region = 159  ;;  %v301_v0 = vld [vmem:[%s300_s23] sm:$0xff] (%p290_p11)  ;;  %v303_v1 = vld [vmem:[%s1380_s7] sm:$0xff] (%p290_p11)  ;;  %s601_s24 = sshll.u32 (%p290_p11), %s966_s9, 1 }
  0xcf   : > { %v302_v2 = vmul.f32 (%p290_p11), 11.313708, %v301_v0  ;;  %s343_s16 = sadd.s32 (%p290_p11), %s962_s0, %s601_s24  ;;  %v599_v14 = vld [vmem:[%s1343_s4] ss:$0 sm:$0xff] (%p290_p11)  ;;  %s1381_s8 = scalar_lea.vmem (%p290_p11), [#allocation9], %s1198_s13 }
  0xd0   : > { %s602_s28 = sshll.u32 (%p290_p11), %s343_s16, 7  ;;  %s350_s20 = sshll.u32 (%p290_p11), %s1381_s8, 4  ;;  %s1275_s20 = int_to_ptr.vmem [resolvable:$true] %s350_s20 }
  0xd1   : > { %v304_v3 = vadd.f32 (%p290_p11), %v303_v1, %v302_v2  ;;  %s1273_s9 = scalar_lea.hbm (%p290_p11), %s1344_s5, %s602_s28  ;;  %s1382_s0 = smov (%p290_p11), %s1381_s8 }
  0xd2   : > { %s1383_s18 = sand.u32 (%p290_p11), 1, %s942_s29   ;;  %s840_s21 = scalar_lea.vmem (%p290_p11), %s1275_s20, 128 }
  0xd3   : > { %305 = vadd.xlane.f32.xlu0 (%p290_p11), %v304_v3  ;;  %s335_s15 = scalar_lea.sflag (%p290_p11), [#allocation8], %s1383_s18  ;;  %p841_p4 = scmp.ne.s32.totalorder (%p290_p11), %s1275_s20, %s840_s21 }
  0xd4   : > { %p1384_p7 = scmp.ne.s32.totalorder (%p290_p11), %s1372_s17, 0  ;;  %s996_s14 = smov (%p290_p11), [#allocation9]  }
  0xd5   : > { %s844_s26 = sshll.u32 %s996_s14, 4  ;;  %s845_s26 = int_to_ptr.vmem [resolvable:$false] %s844_s26 }
  0xd6   : > { %p842_p0 = pnand %p841_p4, %p1384_p7  ;;  %s846_s12 = scalar_lea.vmem %s845_s26, 256 }
  0xd7   : > { %p847_p10 = scmp.lt.s32.totalorder %s1275_s20, %s845_s26  ;;  %p848_p13 = scmp.lt.s32.totalorder %s846_s12, %s840_s21 }
  0xd8   : > { %p843_p5 = pneg %p842_p0 }
  0xd9   : > { %p849_p6 = por %p848_p13, %p847_p10 }
  0xdb   : > { %p850_p1 = pnand %p849_p6, %p843_p5 }
 0x160   : > { %v306_v4 = vpop.xlane.xlu0 %305 }
 0x161   : > { %v308_v5 = vmul.f32 0.0078125, %v306_v4 }
 0x163   : > { %v309_v6 = vsub.f32 %v304_v3, %v308_v5 }
 0x165   : > { %v310_v7 = vmul.f32 %v309_v6, %v309_v6 }
 0x167   : > { %311 = vadd.xlane.f32.xlu0 %v310_v7 }
 0x1f4   : > { %v312_v8 = vpop.xlane.xlu0 %311 }
 0x1f5   : > { %v313_v9 = vmul.f32 0.0078125, %v312_v8 }
 0x1f7   : > { %v314_v10 = vadd.f32 1e-05, %v313_v9 }
 0x1f9   : > { %750 = vrsqrt.f32 %v314_v10 }
 0x203   : > { %v751_v11 = vpop.eup %750 }
 0x204   : > { %v316_v13 = vmul.f32 %v751_v11, %v309_v6 }
 0x206   : > { %v324_v15 = vmul.f32 %v598_v12, %v316_v13 }
 0x208   : > { %v332_v16 = vadd.f32 %v599_v14, %v324_v15 }
 0x20a   : > { %333 = vst [vmem:[%s1382_s0] sm:$0xff] %v332_v16 }
 0x20b   : > { %853 = shalt.err (!%p850_p1)
}
 0x20c   : > { %s854_s13 = scalar_lea.hbm %s1273_s9, 128  ;;  %s858_s19 = scalar_lea.hbm %s1344_s5, 512 }
 0x20d   : > { %p855_p2 = scmp.ne.s32.totalorder %s1273_s9, %s854_s13  ;;  %p859_p12 = scmp.lt.u32.totalorder %s1273_s9, %s1344_s5 }
 0x20e   : > { %p860_p3 = scmp.lt.u32.totalorder %s858_s19, %s854_s13  ;;  %p862_p4 = scmp.lt.u32.totalorder %s854_s13, %s1273_s9 }
 0x20f   : > { %p856_p8 = pnand %p855_p2, %p1384_p7 }
 0x210   : > { %p861_p11 = por %p860_p3, %p859_p12 }
 0x211   : > { %p857_p9 = pneg %p856_p8 }
 0x212   : > { %p863_p0 = por %p862_p4, %p861_p11 }
 0x214   : > { %p864_p5 = pnand %p863_p0, %p857_p9 }
 0x216   : > { %867 = shalt.err (!%p864_p5)
}
 0x217   : > { %625 = dma.vmem_to_hbm [thread:$0]  (%p1384_p7), %s1275_s20, 128, %s1273_s9, %s335_s15  }
 0x218 PF: > { %s1385_s24 = sld [smem:[#allocation26_spill]]  ;;  %s1386_s16 = sld [smem:[#allocation20_spill]] }
 0x219   : > { %s1387_s27 = sld [smem:[#allocation31_spill]] }
 0x21e   : > { %p636_p10 = scmp.ge.s32.totalorder %s1385_s24, 2  ;;  %s362_s2 = sand.u32 1, %s1386_s16  }
 0x21f   : > { %p1388_p13 = scmp.ne.s32.totalorder %s1387_s27, 0  ;;  %s363_s10 = scalar_lea.sflag [#allocation8], %s362_s2 }
 0x221   : > { %p632_p6 = pnand %p636_p10, %p1388_p13 }
 0x223   : > { %933 = dma.done.wait (!%p632_p6), %s363_s10, 128  }
 0x224   : > { %935 = vsyncadd (!%p632_p6), %s363_s10, 4294967168  ;;  %s25_s12 = sadd.s32 1, %s1385_s24   ;;  %s1389_s11 = sld [smem:[#allocation21_spill]] }
 0x225   : > { %p22_p1 = scmp.ge.s32.totalorder %s25_s12, 6   ;;  %s1390_s30 = sld [smem:[#allocation30_spill]] }
 0x226   : > { %s1391_s6 = sld [smem:[#allocation22_spill]]  ;;  %s1392_s7 = sld [smem:[#allocation23_spill]] }
 0x227   : > { %s1393_s8 = sld [smem:[#allocation29_spill]]  ;;  %s1394_s0 = sld [smem:[#allocation24_spill]] }
 0x228   : > { %s1395_s9 = sld [smem:[#allocation25_spill]]  ;;  %s1396_s10 = sld [smem:[#allocation27_spill]] }
 0x229   : > { %s1397_s17 = sld [smem:[#allocation28_spill]]  ;;  %s1398_s28 = smov %s942_s29 }
 0x22a   : > { %s1399_s29 = smov %s1389_s11  ;;  %24 = sbr.rel (!%p22_p1) target bundleno = 21 (0x15), region = 170 }
 0x22f   : > { %s1400_s11 = smov %s1397_s17 }
 0x231   :  { %368 = vsyncpa [#allocation7], 1 }
 0x232   :  { %370 = vsyncpa [#allocation7 + $0x1], 1 }
 0x233   :  { %371 = vsyncpa [#allocation8], 1 }
 0x234   :  { %373 = vsyncpa [#allocation8 + $0x1], 1 }
 0x235   :  { %374 = vsyncmov [#allocation3] }
 0x238   :  { %s375_s20 = vpop.sfrf %374 }
 0x239   :  { %p605_p7 = scmp.ne.s32.totalorder %s375_s20, 0 }
 0x23b   :  { %379 = shalt.err (%p605_p7)  }
 0x23c   :  { %381 = vsyncmov [#allocation3 + $0x1] }
 0x23f   :  { %s382_s22 = vpop.sfrf %381 }
 0x240   :  { %p606_p2 = scmp.ne.s32.totalorder %s382_s22, 0 }
 0x242   :  { %386 = shalt.err (%p606_p2)  }
 0x243   :  { %388 = vsyncmov [#allocation3 + $0x2] }
 0x246   :  { %s389_s18 = vpop.sfrf %388 }
 0x247   :  { %p607_p8 = scmp.ne.s32.totalorder %s389_s18, 0 }
 0x249   :  { %393 = shalt.err (%p607_p8)  }
 0x24a   :  { %395 = vsyncmov [#allocation3 + $0x3] }
 0x24d   :  { %s396_s15 = vpop.sfrf %395 }
 0x24e   :  { %p608_p9 = scmp.ne.s32.totalorder %s396_s15, 0 }
 0x250   :  { %400 = shalt.err (%p608_p9)  }
 0x251   :  { %402 = vsyncmov [#allocation3 + $0x4] }
 0x254   :  { %s403_s1 = vpop.sfrf %402 }
 0x255   :  { %p609_p12 = scmp.ne.s32.totalorder %s403_s1, 0 }
 0x257   :  { %407 = shalt.err (%p609_p12)  }
 0x258   :  { %409 = vsyncmov [#allocation3 + $0x5] }
 0x25b   :  { %s410_s3 = vpop.sfrf %409 }
 0x25c   :  { %p610_p3 = scmp.ne.s32.totalorder %s410_s3, 0 }
 0x25e   :  { %414 = shalt.err (%p610_p3)  }
 0x25f   :  { %416 = vsyncmov [#allocation3 + $0x6] }
 0x262   :  { %s417_s4 = vpop.sfrf %416 }
 0x263   :  { %p611_p11 = scmp.ne.s32.totalorder %s417_s4, 0 }
 0x265   :  { %421 = shalt.err (%p611_p11)  }
 0x266   :  { %423 = vsyncmov [#allocation3 + $0x7] }
 0x269   :  { %s424_s5 = vpop.sfrf %423 }
 0x26a   :  { %p612_p4 = scmp.ne.s32.totalorder %s424_s5, 0 }
 0x26c   :  { %428 = shalt.err (%p612_p4)  }
 0x26d   :  { %430 = vsyncmov [#allocation3 + $0x8] }
 0x270   :  { %s431_s29 = vpop.sfrf %430 }
 0x271   :  { %p613_p0 = scmp.ne.s32.totalorder %s431_s29, 0 }
 0x273   :  { %435 = shalt.err (%p613_p0)  }
 0x274   :  { %437 = vsyncmov [#allocation3 + $0x9] }
 0x277   :  { %s438_s28 = vpop.sfrf %437 }
 0x278   :  { %p614_p5 = scmp.ne.s32.totalorder %s438_s28, 0 }
 0x27a   :  { %442 = shalt.err (%p614_p5)  }
 0x27b   :  { %444 = vsyncmov [#allocation3 + $0xa] }
 0x27e   :  { %s445_s8 = vpop.sfrf %444 }
 0x27f   :  { %p615_p10 = scmp.ne.s32.totalorder %s445_s8, 0 }
 0x281   :  { %449 = shalt.err (%p615_p10)  }
 0x282   :  { %451 = vsyncmov [#allocation3 + $0xb] }
 0x285   :  { %s452_s6 = vpop.sfrf %451 }
 0x286   :  { %p616_p13 = scmp.ne.s32.totalorder %s452_s6, 0 }
 0x288   :  { %456 = shalt.err (%p616_p13)  }
 0x289   :  { %458 = vsyncmov [#allocation3 + $0xc] }
 0x28c   :  { %s459_s9 = vpop.sfrf %458 }
 0x28d   :  { %p617_p6 = scmp.ne.s32.totalorder %s459_s9, 0 }
 0x28f   :  { %463 = shalt.err (%p617_p6)  }
 0x290   :  { %465 = vsyncmov [#allocation3 + $0xd] }
 0x293   :  { %s466_s0 = vpop.sfrf %465 }
 0x294   :  { %p618_p1 = scmp.ne.s32.totalorder %s466_s0, 0 }
 0x296   :  { %470 = shalt.err (%p618_p1)  }
 0x297   :  { %472 = vsyncmov [#allocation3 + $0xe] }
 0x29a   :  { %s473_s21 = vpop.sfrf %472 }
 0x29b   :  { %p619_p7 = scmp.ne.s32.totalorder %s473_s21, 0 }
 0x29d   :  { %477 = shalt.err (%p619_p7)  }
 0x29e   :  { %479 = vsyncmov [#allocation3 + $0xf] }
 0x2a1   :  { %s480_s14 = vpop.sfrf %479 }
 0x2a2   :  { %p620_p2 = scmp.ne.s32.totalorder %s480_s14, 0 }
 0x2a4   :  { %484 = shalt.err (%p620_p2)  }

</bundles_post_ra>
